<compile_context>
chip_gen: v7x
topology: tpu7x:2x2x1
jax: 0.10.0
libtpu: 0.0.40
codegen_flags: <defaults>
</compile_context>

<pallas_src>
import functools

import numpy as np
import jax
import jax.numpy as jnp
from jax.experimental import pallas as pl
from jax.experimental.pallas import tpu as pltpu

LANE = 128
SUBLANE = 8


def _round_up(x, m):
    return ((x + m - 1) // m) * m


def _choose_batch_tile(batch, batch_tile=512):
    """Row-tile policy: tiny batches -> one tile; medium batches -> >=2 tiles
    (v7x megacore); large batches -> big 512-row tiles (v5e/v6e roofline)."""
    if batch <= SUBLANE:
        return batch                      # block dim == full array dim (legal)
    if batch <= 2 * batch_tile:
        return min(batch_tile, _round_up(pl.cdiv(batch, 2), SUBLANE))
    return batch_tile


def _hash_bits_u32(shape, salt_u32):
    """Stateless per-element uint32 random bits (lowbias32-style mix).
    Pure jnp/lax ops -> lowers on Mosaic and in interpret mode."""
    rows = jax.lax.broadcasted_iota(jnp.int32, shape, 0)
    cols = jax.lax.broadcasted_iota(jnp.int32, shape, 1)
    x = (rows * shape[1] + cols).astype(jnp.uint32) + salt_u32
    x = x ^ (x >> 16)
    x = x * jnp.uint32(0x7FEB352D)
    x = x ^ (x >> 15)
    x = x * jnp.uint32(0x846CA68B)
    x = x ^ (x >> 16)
    return x


# ----------------------------------------------------------------------------
# Fused MLP kernel: hidden layers [+ dropout] + ReLU, then head [+ sigmoid]
# ----------------------------------------------------------------------------
def _make_mlp_kernel(*, num_layers, head_act, dropout_p, use_dropout):
    def kernel(*refs):
        idx = 0
        if use_dropout:
            seed_ref = refs[0]
            idx = 1
        x_ref = refs[idx]
        w_refs = refs[idx + 1: idx + 1 + num_layers]
        b_refs = refs[idx + 1 + num_layers: idx + 1 + 2 * num_layers]
        o_ref = refs[idx + 1 + 2 * num_layers]

        if use_dropout:
            # P(drop) = p exactly: keep iff bits >= p * 2^32.
            thresh = jnp.uint32(min(int(round(dropout_p * 4294967296.0)),
                                    4294967295))
            scale = jnp.float32(1.0 / (1.0 - dropout_p))
            # Wide-stride mixing of (seed, tile) so streams never alias across
            # steps or batch tiles.
            salt0 = (seed_ref[0].astype(jnp.uint32) * jnp.uint32(0x9E3779B1)
                     + pl.program_id(0).astype(jnp.uint32) * jnp.uint32(0x85EBCA77))

        h = x_ref[...]
        for li in range(num_layers - 1):
            w = w_refs[li][...]
            y = jnp.dot(h.astype(w.dtype), w,
                        preferred_element_type=jnp.float32) + b_refs[li][...]
            if use_dropout:
                # PyTorch training dropout: zero w.p. p, scale survivors by
                # 1/(1-p).  Applying it before ReLU is equivalent (scale > 0).
                salt = salt0 + jnp.uint32(li + 1) * jnp.uint32(0xC2B2AE3D)
                keep = _hash_bits_u32(y.shape, salt) >= thresh
                y = jnp.where(keep, y * scale, jnp.float32(0.0))
            h = jnp.maximum(y, jnp.float32(0.0))

        w = w_refs[num_layers - 1][...]
        y = jnp.dot(h.astype(w.dtype), w,
                    preferred_element_type=jnp.float32) + b_refs[num_layers - 1][...]
        if head_act == "sigmoid":
            y = jax.nn.sigmoid(y)
        o_ref[...] = y.astype(o_ref.dtype)

    return kernel


# ----------------------------------------------------------------------------
# Wrapper: grid/BlockSpecs; x passed un-padded, weights resident in VMEM.
# ----------------------------------------------------------------------------
def mlp_forward_pallas(x, weights, biases, *, head_act, dropout_p=0.0,
                       training=False, seed=0, batch_tile=512):
    """x: [batch, in_dim] f32 (un-padded).
    weights[i]: [K_i, N_i] bf16 (per-layer zero-padded N to 128 multiples).
    biases[i]:  [1,  N_i] f32.
    Returns [batch, N_last]; caller slices the real output columns."""
    batch, in_dim = x.shape
    num_layers = len(weights)
    out_pad = weights[-1].shape[1]

    tb = _choose_batch_tile(batch, batch_tile)
    grid = (pl.cdiv(batch, tb),)          # partial last tile handled by Pallas

    x_spec = pl.BlockSpec((tb, in_dim), lambda i: (i, 0))
    # Constant index_map -> weights/biases stay resident across grid steps.
    w_specs = [pl.BlockSpec(w.shape, lambda i: (0, 0)) for w in weights]
    b_specs = [pl.BlockSpec(b.shape, lambda i: (0, 0)) for b in biases]
    out_spec = pl.BlockSpec((tb, out_pad), lambda i: (i, 0))

    use_dropout = bool(training) and dropout_p > 0.0
    kernel = _make_mlp_kernel(num_layers=num_layers, head_act=head_act,
                              dropout_p=dropout_p, use_dropout=use_dropout)

    in_specs = []
    args = []
    if use_dropout:
        in_specs.append(pl.BlockSpec(memory_space=pltpu.MemorySpace.SMEM))
        args.append(jnp.asarray([seed], dtype=jnp.int32))
    in_specs += [x_spec] + w_specs + b_specs
    args += [x] + list(weights) + list(biases)

    return pl.pallas_call(
        kernel,
        out_shape=jax.ShapeDtypeStruct((batch, out_pad), jnp.float32),
        grid=grid,
        in_specs=in_specs,
        out_specs=out_spec,
        compiler_params=pltpu.CompilerParams(
            dimension_semantics=("parallel",)),
    )(*args)


# ----------------------------------------------------------------------------
# Module port
# ----------------------------------------------------------------------------
class NetworkPallas:
    """JAX/Pallas port of the PyTorch `Network` module (fused single kernel)."""

    def __init__(self, input_dim, output_dim, net_arch, task, key,
                 param_dtype=jnp.bfloat16):
        assert task in ("regression", "classification")
        self.input_dim = input_dim
        self.output_dim = output_dim
        self.task = task
        self.dropout_probability = 0.5

        dims = [input_dim] + list(net_arch) + [output_dim]
        self.num_layers = len(dims) - 1

        # nn.Linear-style U(-1/sqrt(fan_in), 1/sqrt(fan_in)) init; weights are
        # stored as [in, out] (transpose of PyTorch layout).
        self.params = []        # unpadded f32, for the pure-JAX reference
        self.w_padded = []      # per-layer padded bf16 (kernel inputs)
        self.b_padded = []      # per-layer padded f32 (kernel inputs)
        for li in range(self.num_layers):
            in_f, out_f = dims[li], dims[li + 1]
            key, kw, kb = jax.random.split(key, 3)
            bound = 1.0 / np.sqrt(in_f)
            w = jax.random.uniform(kw, (in_f, out_f), minval=-bound,
                                   maxval=bound, dtype=jnp.float32)
            b = jax.random.uniform(kb, (1, out_f), minval=-bound,
                                   maxval=bound, dtype=jnp.float32)
            self.params.append((w, b))

            # Per-layer padding: first K stays at the real input width (x is
            # passed un-padded); hidden/output widths pad to 128 multiples.
            in_pad = in_f if li == 0 else _round_up(in_f, LANE)
            out_pad = _round_up(out_f, LANE)
            wp = jnp.zeros((in_pad, out_pad), jnp.float32)
            wp = wp.at[:in_f, :out_f].set(w).astype(param_dtype)
            bp = jnp.zeros((1, out_pad), jnp.float32).at[:, :out_f].set(b)
            self.w_padded.append(wp)
            self.b_padded.append(bp)

    def forward(self, x, training=False, seed=0):
        head_act = "sigmoid" if self.task == "classification" else "none"
        out = mlp_forward_pallas(
            x, self.w_padded, self.b_padded,
            head_act=head_act,
            dropout_p=self.dropout_probability,
            training=training, seed=seed)
        return out[:, :self.output_dim]

    # Pure-JAX reference (eval mode) matching the kernel's bf16-weight math.
    def forward_ref(self, x):
        h = x
        for li, (w, b) in enumerate(self.params):
            y = jnp.dot(h.astype(jnp.bfloat16), w.astype(jnp.bfloat16),
                        preferred_element_type=jnp.float32) + b
            if li < self.num_layers - 1:
                h = jnp.maximum(y, 0.0)   # eval: dropout is identity
            else:
                out = y
        if self.task == "classification":
            out = jax.nn.sigmoid(out)
        # NOTE: the original module builds nn.Softplus for 'regression' but
        # never applies it in forward(); we match that behaviour exactly.
        return out


if __name__ == "__main__":
    key = jax.random.PRNGKey(0)
    key, kx1, kx2, kreg, kcls = jax.random.split(key, 5)

    input_dim, output_dim = 16, 2
    net_arch = [32, 32]

    x_small = jax.random.normal(kx1, (8, input_dim), dtype=jnp.float32)
    x_med = jax.random.normal(kx2, (48, input_dim), dtype=jnp.float32)  # 2 grid steps

    ok = True
    for task, kinit in (("regression", kreg), ("classification", kcls)):
        net = NetworkPallas(input_dim, output_dim, net_arch, task, kinit)

        # Eval-mode (deterministic) forward: must match the pure-JAX reference.
        for x in (x_small, x_med):
            out = jax.block_until_ready(net.forward(x, training=False))
            ref = np.asarray(net.forward_ref(x))
            if out.shape != (x.shape[0], output_dim):
                ok = False
            if not np.allclose(np.asarray(out), ref, atol=5e-3, rtol=5e-3):
                ok = False

        # Training-mode forward (in-kernel hash-PRNG dropout): check that it
        # runs, has the right shape, and is finite.
        out_tr = jax.block_until_ready(net.forward(x_small, training=True, seed=42))
        if out_tr.shape != (x_small.shape[0], output_dim):
            ok = False
        if not np.all(np.isfinite(np.asarray(out_tr))):
            ok = False

    print("KERNEL_OK" if ok else "KERNEL_MISMATCH")
</pallas_src>

<mosaic_0001>
module attributes {stable_mosaic.version = 11 : i64} {
  func.func @kernel(%arg0: i32, %arg1: memref<8x16xf32, #tpu.memory_space<vmem>>, %arg2: memref<16x128xbf16, #tpu.memory_space<vmem>>, %arg3: memref<128x128xbf16, #tpu.memory_space<vmem>>, %arg4: memref<128x128xbf16, #tpu.memory_space<vmem>>, %arg5: memref<1x128xf32, #tpu.memory_space<vmem>>, %arg6: memref<1x128xf32, #tpu.memory_space<vmem>>, %arg7: memref<1x128xf32, #tpu.memory_space<vmem>>, %arg8: memref<8x128xf32, #tpu.memory_space<vmem>>) attributes {dimension_semantics = [#tpu.dimension_semantics<parallel>], iteration_bounds = array<i64: 1>, scalar_prefetch = 0 : i64, scratch_operands = 0 : i64, tpu.core_type = #tpu.core_type<tc>, window_params = [{transform_indices = @transform_0, window_bounds = array<i64: 8, 16>}, {pipeline_mode = #tpu.pipeline_mode<synchronous>, transform_indices = @transform_1, window_bounds = array<i64: 16, 128>}, {pipeline_mode = #tpu.pipeline_mode<synchronous>, transform_indices = @transform_2, window_bounds = array<i64: 128, 128>}, {pipeline_mode = #tpu.pipeline_mode<synchronous>, transform_indices = @transform_3, window_bounds = array<i64: 128, 128>}, {pipeline_mode = #tpu.pipeline_mode<synchronous>, transform_indices = @transform_4, window_bounds = array<i64: 1, 128>}, {pipeline_mode = #tpu.pipeline_mode<synchronous>, transform_indices = @transform_5, window_bounds = array<i64: 1, 128>}, {pipeline_mode = #tpu.pipeline_mode<synchronous>, transform_indices = @transform_6, window_bounds = array<i64: 1, 128>}, {transform_indices = @transform_7, window_bounds = array<i64: 8, 128>}]} {
    %c0 = arith.constant 0 : index
    %c0_0 = arith.constant 0 : index
    %0 = vector.load %arg1[%c0, %c0_0] : memref<8x16xf32, #tpu.memory_space<vmem>>, vector<8x16xf32>
    %c0_1 = arith.constant 0 : index
    %c0_2 = arith.constant 0 : index
    %1 = vector.load %arg2[%c0_1, %c0_2] : memref<16x128xbf16, #tpu.memory_space<vmem>>, vector<16x128xbf16>
    %2 = arith.truncf %0 : vector<8x16xf32> to vector<8x16xbf16>
    %cst = arith.constant dense<0.000000e+00> : vector<8x128xf32>
    %3 = tpu.matmul %2, %1, %cst {dimension_numbers = #tpu.dot_dimension_numbers<[1], [0], [0], [1], [0, 0, 1, 1], [], []>} : vector<8x16xbf16>, vector<16x128xbf16>, vector<8x128xf32> -> vector<8x128xf32>
    %c0_3 = arith.constant 0 : index
    %c0_4 = arith.constant 0 : index
    %4 = vector.load %arg5[%c0_3, %c0_4] : memref<1x128xf32, #tpu.memory_space<vmem>>, vector<1x128xf32>
    %5 = vector.broadcast %4 : vector<1x128xf32> to vector<8x128xf32>
    %6 = arith.addf %3, %5 : vector<8x128xf32>
    %cst_5 = arith.constant 0.000000e+00 : f32
    %7 = vector.broadcast %cst_5 : f32 to vector<8x128xf32>
    %8 = arith.maximumf %6, %7 : vector<8x128xf32>
    %c0_6 = arith.constant 0 : index
    %c0_7 = arith.constant 0 : index
    %9 = vector.load %arg3[%c0_6, %c0_7] : memref<128x128xbf16, #tpu.memory_space<vmem>>, vector<128x128xbf16>
    %10 = arith.truncf %8 : vector<8x128xf32> to vector<8x128xbf16>
    %cst_8 = arith.constant dense<0.000000e+00> : vector<8x128xf32>
    %11 = tpu.matmul %10, %9, %cst_8 {dimension_numbers = #tpu.dot_dimension_numbers<[1], [0], [0], [1], [0, 0, 1, 1], [], []>} : vector<8x128xbf16>, vector<128x128xbf16>, vector<8x128xf32> -> vector<8x128xf32>
    %c0_9 = arith.constant 0 : index
    %c0_10 = arith.constant 0 : index
    %12 = vector.load %arg6[%c0_9, %c0_10] : memref<1x128xf32, #tpu.memory_space<vmem>>, vector<1x128xf32>
    %13 = vector.broadcast %12 : vector<1x128xf32> to vector<8x128xf32>
    %14 = arith.addf %11, %13 : vector<8x128xf32>
    %cst_11 = arith.constant 0.000000e+00 : f32
    %15 = vector.broadcast %cst_11 : f32 to vector<8x128xf32>
    %16 = arith.maximumf %14, %15 : vector<8x128xf32>
    %c0_12 = arith.constant 0 : index
    %c0_13 = arith.constant 0 : index
    %17 = vector.load %arg4[%c0_12, %c0_13] : memref<128x128xbf16, #tpu.memory_space<vmem>>, vector<128x128xbf16>
    %18 = arith.truncf %16 : vector<8x128xf32> to vector<8x128xbf16>
    %cst_14 = arith.constant dense<0.000000e+00> : vector<8x128xf32>
    %19 = tpu.matmul %18, %17, %cst_14 {dimension_numbers = #tpu.dot_dimension_numbers<[1], [0], [0], [1], [0, 0, 1, 1], [], []>} : vector<8x128xbf16>, vector<128x128xbf16>, vector<8x128xf32> -> vector<8x128xf32>
    %c0_15 = arith.constant 0 : index
    %c0_16 = arith.constant 0 : index
    %20 = vector.load %arg7[%c0_15, %c0_16] : memref<1x128xf32, #tpu.memory_space<vmem>>, vector<1x128xf32>
    %21 = vector.broadcast %20 : vector<1x128xf32> to vector<8x128xf32>
    %22 = arith.addf %19, %21 : vector<8x128xf32>
    %c0_17 = arith.constant 0 : index
    %c0_18 = arith.constant 0 : index
    %23 = vector.load %arg8[%c0_17, %c0_18] : memref<8x128xf32, #tpu.memory_space<vmem>>, vector<8x128xf32>
    tpu.vector_store %arg8[%c0_17, %c0_18], %22 {strides = array<i32>} : memref<8x128xf32, #tpu.memory_space<vmem>>, vector<8x128xf32>,
    return
  }
  func.func @transform_0(%arg0: i32) -> (i32, i32) {
    %c0_i32 = arith.constant 0 : i32
    %c0_i32_0 = arith.constant 0 : i32
    return %arg0, %c0_i32 : i32, i32
  }
  func.func @transform_1(%arg0: i32) -> (i32, i32) {
    %c0_i32 = arith.constant 0 : i32
    %c0_i32_0 = arith.constant 0 : i32
    %c0_i32_1 = arith.constant 0 : i32
    return %c0_i32, %c0_i32_0 : i32, i32
  }
  func.func @transform_2(%arg0: i32) -> (i32, i32) {
    %c0_i32 = arith.constant 0 : i32
    %c0_i32_0 = arith.constant 0 : i32
    %c0_i32_1 = arith.constant 0 : i32
    return %c0_i32, %c0_i32_0 : i32, i32
  }
  func.func @transform_3(%arg0: i32) -> (i32, i32) {
    %c0_i32 = arith.constant 0 : i32
    %c0_i32_0 = arith.constant 0 : i32
    %c0_i32_1 = arith.constant 0 : i32
    return %c0_i32, %c0_i32_0 : i32, i32
  }
  func.func @transform_4(%arg0: i32) -> (i32, i32) {
    %c0_i32 = arith.constant 0 : i32
    %c0_i32_0 = arith.constant 0 : i32
    %c0_i32_1 = arith.constant 0 : i32
    return %c0_i32, %c0_i32_0 : i32, i32
  }
  func.func @transform_5(%arg0: i32) -> (i32, i32) {
    %c0_i32 = arith.constant 0 : i32
    %c0_i32_0 = arith.constant 0 : i32
    %c0_i32_1 = arith.constant 0 : i32
    return %c0_i32, %c0_i32_0 : i32, i32
  }
  func.func @transform_6(%arg0: i32) -> (i32, i32) {
    %c0_i32 = arith.constant 0 : i32
    %c0_i32_0 = arith.constant 0 : i32
    %c0_i32_1 = arith.constant 0 : i32
    return %c0_i32, %c0_i32_0 : i32, i32
  }
  func.func @transform_7(%arg0: i32) -> (i32, i32) {
    %c0_i32 = arith.constant 0 : i32
    %c0_i32_0 = arith.constant 0 : i32
    return %arg0, %c0_i32 : i32, i32
  }
}

</mosaic_0001>

<bundles_post_ra>
// kernel: tpu_custom_call.1
= control target key start
LH: loop header
LB: loop body
LE: loop exit
PB: predicated region body
PF: predicated region fallthrough
CT: control target
= control target key end

     0   :  { %12 = vsyncpa [#allocation3], 0  ;;  %s764_s0 = inlined_call_operand.hbm [shape: f32[8,16], index: 0, kind: input, shape index: {}]   ;;  %s765_s1 = inlined_call_operand.hbm [shape: bf16[16,128], index: 1, kind: input, shape index: {}]   ;;  %s766_s2 = inlined_call_operand.hbm [shape: bf16[128,128], index: 2, kind: input, shape index: {}]   ;;  %s767_s3 = inlined_call_operand.hbm [shape: bf16[128,128], index: 3, kind: input, shape index: {}]   ;;  %s768_s4 = inlined_call_operand.vmem [shape: f32[1,128], index: 4, kind: input, shape index: {}]   ;;  %s769_s5 = inlined_call_operand.vmem [shape: f32[1,128], index: 5, kind: input, shape index: {}]   ;;  %s770_s6 = inlined_call_operand.vmem [shape: f32[1,128], index: 6, kind: input, shape index: {}]   ;;  %s771_s7 = inlined_call_operand.hbm [shape: f32[8,128], index: 7, kind: output, shape index: {}]  }
   0x1   :  { %13 = vsyncpa [#allocation6], 0 }
   0x2   :  { %14 = vsyncpa [#allocation9], 0 }
   0x3   :  { %15 = vsyncpa [#allocation4], 0  ;;  %s617_s24 = smov [#allocation5]   ;;  %s499_s28 = scalar_lea.hbm %s765_s1, 128 }
   0x4   :  { %s31_s25 = sshll.u32 %s617_s24, 4  ;;  %p500_p0 = scmp.ne.s32.totalorder %s765_s1, %s499_s28  ;;  %s32_s25 = int_to_ptr.vmem [resolvable:$true] %s31_s25 }
   0x5   :  { %p503_p1 = scmp.lt.u32.totalorder %s499_s28, %s765_s1 }
   0x7   :  { %p505_p2 = pnand %p503_p1, %p500_p0 }
   0x9   :  { %508 = shalt.err (!%p505_p2)
}
   0xa   :  { %s509_s10 = scalar_lea.vmem %s32_s25, 128  ;;  %p514_p4 = scmp.lt.s32.totalorder %s32_s25, %s32_s25 }
   0xb   :  { %p510_p3 = scmp.ne.s32.totalorder %s32_s25, %s509_s10  ;;  %p515_p5 = scmp.lt.s32.totalorder %s509_s10, %s509_s10 }
   0xd   :  { %p516_p6 = por %p515_p5, %p514_p4 }
   0xf   :  { %p517_p7 = pnand %p516_p6, %p510_p3 }
  0x11   :  { %520 = shalt.err (!%p517_p7)
}
  0x12   :  { %s618_s11 = smov 64   ;;  %s619_s12 = smov 4  }
  0x13   :  { %37 = dma.hbm_to_vmem [thread:$0]  %s765_s1, 128, %s32_s25, [#allocation6], %s618_s11, %s618_s11, %s619_s12  }
  0x14   :  { %s620_s15 = smov [#allocation2]   ;;  %s621_s17 = smov [#allocation7]  }
  0x15   :  { %s22_s16 = sshll.u32 %s620_s15, 4  ;;  %s43_s18 = sshll.u32 %s621_s17, 4  ;;  %s23_s16 = int_to_ptr.vmem [resolvable:$true] %s22_s16  ;;  %s44_s18 = int_to_ptr.vmem [resolvable:$true] %s43_s18 }
  0x16   :  { %s521_s21 = scalar_lea.hbm %s764_s0, 128 }
  0x17   :  { %p522_p8 = scmp.ne.s32.totalorder %s764_s0, %s521_s21  ;;  %p525_p9 = scmp.lt.u32.totalorder %s521_s21, %s764_s0 }
  0x19   :  { %p527_p10 = pnand %p525_p9, %p522_p8 }
  0x1b   :  { %530 = shalt.err (!%p527_p10)
}
  0x1c   :  { %s531_s1 = scalar_lea.vmem %s23_s16, 128  ;;  %p536_p12 = scmp.lt.s32.totalorder %s23_s16, %s23_s16 }
  0x1d   :  { %p532_p11 = scmp.ne.s32.totalorder %s23_s16, %s531_s1  ;;  %p537_p13 = scmp.lt.s32.totalorder %s531_s1, %s531_s1 }
  0x1f   :  { %p538_p0 = por %p537_p13, %p536_p12 }
  0x21   :  { %p539_p1 = pnand %p538_p0, %p532_p11 }
  0x23   :  { %542 = shalt.err (!%p539_p1)
}
  0x24   :  { %25 = dma.hbm_to_vmem [thread:$0]  %s764_s0, 128, %s23_s16, [#allocation3]  }
  0x25   :  { %s543_s30 = scalar_lea.hbm %s766_s2, 1024 }
  0x26   :  { %p544_p2 = scmp.ne.s32.totalorder %s766_s2, %s543_s30  ;;  %p547_p3 = scmp.lt.u32.totalorder %s543_s30, %s766_s2 }
  0x28   :  { %p549_p4 = pnand %p547_p3, %p544_p2 }
  0x2a   :  { %552 = shalt.err (!%p549_p4)
}
  0x2b   :  { %s553_s14 = scalar_lea.vmem %s44_s18, 1024  ;;  %p558_p6 = scmp.lt.s32.totalorder %s44_s18, %s44_s18 }
  0x2c   :  { %p554_p5 = scmp.ne.s32.totalorder %s44_s18, %s553_s14  ;;  %p559_p7 = scmp.lt.s32.totalorder %s553_s14, %s553_s14 }
  0x2e   :  { %p560_p8 = por %p559_p7, %p558_p6 }
  0x30   :  { %p561_p9 = pnand %p560_p8, %p554_p5 }
  0x32   :  { %564 = shalt.err (!%p561_p9)
}
  0x33   :  { %49 = dma.hbm_to_vmem [thread:$0]  %s766_s2, 1024, %s44_s18, [#allocation6], %s618_s11, %s618_s11, %s619_s12  }
  0x34   :  { %s622_s16 = smov [#allocation8]   ;;  %s565_s21 = scalar_lea.hbm %s767_s3, 1024 }
  0x35   :  { %s55_s17 = sshll.u32 %s622_s16, 4  ;;  %p566_p10 = scmp.ne.s32.totalorder %s767_s3, %s565_s21  ;;  %s56_s17 = int_to_ptr.vmem [resolvable:$true] %s55_s17 }
  0x36   :  { %p569_p11 = scmp.lt.u32.totalorder %s565_s21, %s767_s3 }
  0x38   :  { %p571_p12 = pnand %p569_p11, %p566_p10 }
  0x3a   :  { %574 = shalt.err (!%p571_p12)
}
  0x3b   :  { %s575_s1 = scalar_lea.vmem %s56_s17, 1024  ;;  %p580_p0 = scmp.lt.s32.totalorder %s56_s17, %s56_s17 }
  0x3c   :  { %p576_p13 = scmp.ne.s32.totalorder %s56_s17, %s575_s1  ;;  %p581_p1 = scmp.lt.s32.totalorder %s575_s1, %s575_s1 }
  0x3e   :  { %p582_p2 = por %p581_p1, %p580_p0 }
  0x40   :  { %p583_p3 = pnand %p582_p2, %p576_p13 }
  0x42   :  { %586 = shalt.err (!%p583_p3)
}
  0x43   :  { %61 = dma.hbm_to_vmem [thread:$0]  %s767_s3, 1024, %s56_s17, [#allocation9], %s618_s11, %s618_s11, %s619_s12  }
  0x44   :  { %609 = dma.done.wait [#allocation3], 128  }
  0x45   :  { %610 = vsyncadd [#allocation3], 4294967168 }
  0x46   :  { %611 = dma.done.wait [#allocation6], 1152  }
  0x47   :  { %612 = vsyncadd [#allocation6], 4294966144 }
  0x48   :  { %613 = dma.done.wait [#allocation9], 1024  }
  0x49   :  { %614 = vsyncadd [#allocation9], 4294966272  ;;  %v623_v0 = vmov 0.0   ;;  %vm624_vm0 = vmmov 0   ;;  %v482_v1 = vld [vmem:[#allocation5] sm:$0xff]   ;;  %v81_v2 = vld [vmem:[#allocation2] sm:$0xff] }
  0x4a   :  { %427 = vmatprep.subr.bf16.mxu0 %v623_v0  ;;  %429 = vmatprep.mubr.msk.bf16.mxu0 %vm624_vm0, %v623_v0  ;;  %v84_v3 = vpack.c.bf16 %v81_v2, %v81_v2  ;;  %vm98_vm1 = vcmask 130048   ;;  %v483_v4 = vld [vmem:[#allocation7] sm:$0xff]   ;;  %v484_v5 = vld [vmem:[#allocation7 + $0x8] sm:$0xff]   ;;  %v485_v6 = vld [vmem:[#allocation7 + $0x10] sm:$0xff]   ;;  %s625_s28 = smov [#allocation10]  }
  0x4b   :  { %433 = vmatprep.subr.bf16.mxu1 %v623_v0  ;;  %449 = vmatprep.mubr.msk.bf16.mxu1 %vm624_vm0, %v623_v0  ;;  %v486_v7 = vld [vmem:[#allocation7 + $0x18] sm:$0xff]   ;;  %v487_v8 = vld [vmem:[#allocation7 + $0x20] sm:$0xff]   ;;  %v488_v9 = vld [vmem:[#allocation7 + $0x28] sm:$0xff]   ;;  %s375_s29 = sshll.u32 %s625_s28, 4  ;;  %s376_s29 = int_to_ptr.vmem [resolvable:$true] %s375_s29 }
  0x4c   :  { %428 = vmatpush3.bf16.msra.mxu0 %v482_v1  ;;  %434 = vmatpush3.bf16.msra.mxu1 %v483_v4  ;;  %v489_v10 = vld [vmem:[#allocation7 + $0x30] sm:$0xff]   ;;  %v490_v11 = vld [vmem:[#allocation7 + $0x38] sm:$0xff]   ;;  %v491_v12 = vld [vmem:[#allocation8] sm:$0xff]   ;;  %p592_p5 = scmp.lt.s32.totalorder %s376_s29, %s376_s29 }
  0x4d   :  { %453 = vmatprep.subr.bf16.mxu0 %v623_v0  ;;  %435 = vmatprep.subr.bf16.mxu1 %v623_v0  ;;  %v492_v13 = vld [vmem:[#allocation8 + $0x8] sm:$0xff]   ;;  %v493_v14 = vld [vmem:[#allocation8 + $0x10] sm:$0xff]   ;;  %v494_v15 = vld [vmem:[#allocation8 + $0x18] sm:$0xff]  }
  0x4e   :  { %v495_v16 = vld [vmem:[#allocation8 + $0x20] sm:$0xff]   ;;  %v496_v17 = vld [vmem:[#allocation8 + $0x28] sm:$0xff]   ;;  %v386_v18 = vld [vmem:[%s768_s4] ss:$0 sm:$0xff] }
  0x4f   :  { %430 = vmatmul.mubr.msk.bf16.vlgmr.msra.gmra.mrb[0].mxu0 %vm98_vm1, %v84_v3  ;;  %v497_v26 = vld [vmem:[#allocation8 + $0x30] sm:$0xff]   ;;  %v498_v27 = vld [vmem:[#allocation8 + $0x38] sm:$0xff]  }
  0x50   :  { %469 = vmatprep.mubr.msk.bf16.mxu0 %vm624_vm0, %v623_v0  ;;  %436 = vmatpush3.bf16.msra.mxu1 %v484_v5  ;;  %v389_v28 = vld [vmem:[%s769_s5] ss:$0 sm:$0xff]  ;;  %s587_s5 = scalar_lea.vmem %s376_s29, 128 }
  0x51   :  { %437 = vmatprep.subr.bf16.mxu1 %v623_v0  ;;  %454 = vmatpush3.bf16.msra.mxu0 %v491_v12  ;;  %v398_v36 = vld [vmem:[%s770_s6] ss:$0 sm:$0xff]  ;;  %p588_p4 = scmp.ne.s32.totalorder %s376_s29, %s587_s5  ;;  %p593_p6 = scmp.lt.s32.totalorder %s587_s5, %s587_s5 }
  0x52   :  { %455 = vmatprep.subr.bf16.mxu0 %v623_v0 }
  0x53   :  { %p594_p7 = por %p593_p6, %p592_p5 }
  0x54   :  { %438 = vmatpush3.bf16.msra.mxu1 %v485_v6 }
  0x55   :  { %439 = vmatprep.subr.bf16.mxu1 %v623_v0  ;;  %456 = vmatpush3.bf16.msra.mxu0 %v492_v13  ;;  %p595_p8 = pnand %p594_p7, %p588_p4 }
  0x56   :  { %457 = vmatprep.subr.bf16.mxu0 %v623_v0 }
  0x58   :  { %440 = vmatpush3.bf16.msra.mxu1 %v486_v7 }
  0x59   :  { %441 = vmatprep.subr.bf16.mxu1 %v623_v0  ;;  %458 = vmatpush3.bf16.msra.mxu0 %v493_v14 }
  0x5a   :  { %459 = vmatprep.subr.bf16.mxu0 %v623_v0 }
  0x5c   :  { %442 = vmatpush3.bf16.msra.mxu1 %v487_v8 }
  0x5d   :  { %443 = vmatprep.subr.bf16.mxu1 %v623_v0  ;;  %460 = vmatpush3.bf16.msra.mxu0 %v494_v15 }
  0x5e   :  { %461 = vmatprep.subr.bf16.mxu0 %v623_v0 }
  0x60   :  { %444 = vmatpush3.bf16.msra.mxu1 %v488_v9 }
  0x61   :  { %445 = vmatprep.subr.bf16.mxu1 %v623_v0  ;;  %462 = vmatpush3.bf16.msra.mxu0 %v495_v16 }
  0x62   :  { %463 = vmatprep.subr.bf16.mxu0 %v623_v0 }
  0x64   :  { %446 = vmatpush3.bf16.msra.mxu1 %v489_v10 }
  0x65   :  { %447 = vmatprep.subr.bf16.mxu1 %v623_v0  ;;  %464 = vmatpush3.bf16.msra.mxu0 %v496_v17 }
  0x66   :  { %465 = vmatprep.subr.bf16.mxu0 %v623_v0 }
  0x68   :  { %448 = vmatpush3.bf16.msra.mxu1 %v490_v11 }
  0x69   :  { %466 = vmatpush3.bf16.msra.mxu0 %v497_v26 }
  0x6a   :  { %467 = vmatprep.subr.bf16.mxu0 %v623_v0 }
  0x6d   :  { %468 = vmatpush3.bf16.msra.mxu0 %v498_v27 }
 0x122   :  { %v136_v19 = vpop.f32.mrb[0].mxu0 }
 0x123   :  { %v137_v20 = vadd.f32 %v386_v18, %v136_v19  ;;  %v431_v21 = vpop.f32.mrb[1].mxu0 }
 0x124   :  { %v139_v22 = vpop.f32.mrb[2].mxu0 }
 0x125   :  { %v142_v23 = vmax.f32 %v137_v20, 0.0  ;;  %v432_v24 = vpop.f32.mrb[3].mxu0 }
 0x127   :  { %v159_v25 = vpack.c.bf16 %v142_v23, %v142_v23 }
 0x129   :  { %450 = vmatmul.mubr.bf16.vlgmr.msra.gmra.mrb[0].mxu1 %v159_v25 }
 0x1fc   :  { %v249_v29 = vpop.f32.mrb[0].mxu1 }
 0x1fd   :  { %v250_v30 = vadd.f32 %v389_v28, %v249_v29  ;;  %v451_v31 = vpop.f32.mrb[1].mxu1 }
 0x1fe   :  { %v252_v32 = vpop.f32.mrb[2].mxu1 }
 0x1ff   :  { %v255_v33 = vmax.f32 %v250_v30, 0.0  ;;  %v452_v34 = vpop.f32.mrb[3].mxu1 }
 0x201   :  { %v272_v35 = vpack.c.bf16 %v255_v33, %v255_v33 }
 0x203   :  { %470 = vmatmul.mubr.bf16.vlgmr.msra.gmra.mrb[4].mxu0 %v272_v35 }
 0x2d6   :  { %v362_v37 = vpop.f32.mrb[4].mxu0 }
 0x2d7   :  { %v363_v38 = vadd.f32 %v398_v36, %v362_v37  ;;  %v471_v39 = vpop.f32.mrb[5].mxu0 }
 0x2d8   :  { %v365_v40 = vpop.f32.mrb[6].mxu0 }
 0x2d9   :  { %368 = vst [vmem:[#allocation10] sm:$0xff] %v363_v38  ;;  %v472_v41 = vpop.f32.mrb[7].mxu0 }
 0x2da   :  { %598 = shalt.err (!%p595_p8)
}
 0x2db   :  { %s599_s6 = scalar_lea.hbm %s771_s7, 128 }
 0x2dc   :  { %p600_p9 = scmp.ne.s32.totalorder %s771_s7, %s599_s6  ;;  %p603_p10 = scmp.lt.u32.totalorder %s599_s6, %s771_s7 }
 0x2de   :  { %p605_p11 = pnand %p603_p10, %p600_p9 }
 0x2e0   :  { %608 = shalt.err (!%p605_p11)
}
 0x2e1   :  { %378 = dma.vmem_to_hbm [thread:$0]  %s376_s29, 128, %s771_s7, [#allocation4]  }
 0x2e2   :  { %615 = dma.done.wait [#allocation4], 128  }
 0x2e3   :  { %616 = vsyncadd [#allocation4], 4294967168 }
 0x2e4   :  { %382 = vsyncpa [#allocation3], 1 }
 0x2e5   :  { %383 = vsyncpa [#allocation6], 1 }
 0x2e6   :  { %384 = vsyncpa [#allocation9], 1 }
 0x2e7   :  { %385 = vsyncpa [#allocation4], 1 }

</bundles_post_ra>
